<compile_context>
chip_gen: v7x
topology: tpu7x:2x2x1
jax: 0.10.0
libtpu: 0.0.40
codegen_flags: <defaults>
</compile_context>

<pallas_src>
import math
import functools

import jax
import jax.numpy as jnp
from jax import lax
from jax.experimental import pallas as pl
from jax.experimental.pallas import tpu as pltpu

LANES = 128
SUBLANES = 8
TARGET_BLOCK_BYTES = 4 * 1024 * 1024    # per-input block
VMEM_LIMIT_BYTES = 48 * 1024 * 1024


def _pred_loss_kernel(p_ref, t_ref, x_ref, o_ref, acc_ref, *,
                      total_rows, block_rows, blocks_per_core):
    c = pl.program_id(0)   # core-split index (a TensorCore on v7x)
    j = pl.program_id(1)   # reduction step within this split

    @pl.when(j == 0)
    def _():
        acc_ref[...] = jnp.zeros_like(acc_ref)

    start_row = (c * blocks_per_core + j) * block_rows
    # Masking is only needed when this block overhangs the array: the partial
    # trailing block or a clamped duplicate block of an uneven core split.
    needs_mask = start_row + block_rows > total_rows

    def accumulate(apply_mask):
        # In-kernel upcast: HBM traffic stays at the input dtype width.
        p = p_ref[...].astype(jnp.float32)
        t = t_ref[...].astype(jnp.float32)
        x = x_ref[...].astype(jnp.float32)
        # d = sign(t - x) - sign(p - x) via compares; values equal to 0 stay 0
        # (matches residual[residual>0]=1; residual[residual<0]=-1).
        d = ((t > x).astype(jnp.float32) - (t < x).astype(jnp.float32)
             - (p > x).astype(jnp.float32) + (p < x).astype(jnp.float32))
        term = d * d + jnp.abs(p - t)
        if apply_mask:
            row = lax.broadcasted_iota(jnp.int32, term.shape, 0)
            term = jnp.where(start_row + row < total_rows, term, 0.0)
        # Fold the block into the small accumulator: pure vreg-wise VPU adds,
        # no cross-lane work until the final step.
        acc_ref[...] += term.reshape(-1, SUBLANES, LANES).sum(axis=0)

    @pl.when(needs_mask)
    def _():
        accumulate(True)

    @pl.when(jnp.logical_not(needs_mask))
    def _():
        accumulate(False)

    @pl.when(j == pl.num_programs(1) - 1)
    def _():
        o_ref[...] = jnp.sum(acc_ref[...]).reshape(1, 1, 1)


def _core_split_config(nblocks):
    """1 split on single-TC chips (v5e/v6e) or tiny grids; 2 on v7x."""
    if nblocks < 2:
        return 1, "arbitrary"
    try:
        kind = jax.devices()[0].device_kind.lower()
    except Exception:
        return 1, "arbitrary"
    if "v7" in kind or "7x" in kind:
        return 2, getattr(pltpu, "CORE_PARALLEL", "parallel")
    return 1, "arbitrary"


def pred_loss(pred, true, inp):
    """Equivalent to PredLoss.forward(pred, true, input)."""
    assert pred.shape == true.shape == inp.shape
    n = math.prod(pred.shape)

    p = pred.reshape(-1)
    t = true.reshape(-1)
    x = inp.reshape(-1)
    # Pad to a multiple of 8*128 so every row count is (8,128)-aligned; the
    # zero-padded elements contribute exactly 0 to both sums.
    pad = (-n) % (SUBLANES * LANES)
    if pad:
        p = jnp.pad(p, (0, pad))
        t = jnp.pad(t, (0, pad))
        x = jnp.pad(x, (0, pad))
    rows = (n + pad) // LANES
    p2 = p.reshape(rows, LANES)
    t2 = t.reshape(rows, LANES)
    x2 = x.reshape(rows, LANES)

    # Block sized by bytes (dtype-aware): 8192 rows for f32, 16384 for bf16.
    itemsize = max(p2.dtype.itemsize, t2.dtype.itemsize, x2.dtype.itemsize)
    max_block_rows = max(SUBLANES, TARGET_BLOCK_BYTES // (LANES * itemsize))
    block_rows = min(rows, max_block_rows)
    nblocks = pl.cdiv(rows, block_rows)

    core_splits, core_sem = _core_split_config(nblocks)
    blocks_per_core = pl.cdiv(nblocks, core_splits)

    kernel = functools.partial(
        _pred_loss_kernel,
        total_rows=rows,
        block_rows=block_rows,
        blocks_per_core=blocks_per_core,
    )

    def in_map(c, j):
        # Clamp so an overhanging step of an uneven split never DMAs past the
        # array; its contribution is masked to zero inside the kernel.
        return (jnp.minimum(c * blocks_per_core + j, nblocks - 1), 0)

    in_spec = pl.BlockSpec((block_rows, LANES), in_map)

    partials = pl.pallas_call(
        kernel,
        out_shape=jax.ShapeDtypeStruct((core_splits, 1, 1), jnp.float32),
        grid_spec=pltpu.PrefetchScalarGridSpec(
            num_scalar_prefetch=0,
            grid=(core_splits, blocks_per_core),
            in_specs=[in_spec, in_spec, in_spec],
            out_specs=pl.BlockSpec((1, 1, 1), lambda c, j: (c, 0, 0)),
            scratch_shapes=[pltpu.VMEM((SUBLANES, LANES), jnp.float32)],
        ),
        compiler_params=pltpu.CompilerParams(
            dimension_semantics=(core_sem, "arbitrary"),
            vmem_limit_bytes=VMEM_LIMIT_BYTES,
        ),
    )(p2, t2, x2)

    return jnp.sum(partials) / jnp.float32(n)


def _reference(pred, true, inp):
    # Plain-JAX reference of the PyTorch module (finite inputs).
    r1 = jnp.sign(true - inp)
    r2 = jnp.sign(pred - inp)
    return jnp.mean((r1 - r2) ** 2) + jnp.mean(jnp.abs(pred - true))


if __name__ == "__main__":
    key = jax.random.PRNGKey(0)

    # Primary check: (bs, num_classes, H, W) = (2, 4, 16, 16).
    k1, k2, k3, k4 = jax.random.split(key, 4)
    shape = (2, 4, 16, 16)
    pred = jax.random.normal(k1, shape, dtype=jnp.float32)
    true = jax.random.normal(k2, shape, dtype=jnp.float32)
    inp = jax.random.normal(k3, shape, dtype=jnp.float32)

    loss = pred_loss(pred, true, inp)
    jax.block_until_ready(loss)
    ref = _reference(pred, true, inp)
    assert jnp.allclose(loss, ref, rtol=1e-5, atol=1e-6), (loss, ref)

    # Secondary check: lane-unaligned element count exercises the pad path.
    shape2 = (3, 5, 7, 9)
    ka, kb, kc = jax.random.split(k4, 3)
    pred2 = jax.random.normal(ka, shape2, dtype=jnp.float32)
    true2 = jax.random.normal(kb, shape2, dtype=jnp.float32)
    inp2 = jax.random.normal(kc, shape2, dtype=jnp.float32)
    loss2 = pred_loss(pred2, true2, inp2)
    jax.block_until_ready(loss2)
    ref2 = _reference(pred2, true2, inp2)
    assert jnp.allclose(loss2, ref2, rtol=1e-5, atol=1e-6), (loss2, ref2)

    print("KERNEL_OK")
</pallas_src>

<mosaic_0001>
module attributes {stable_mosaic.version = 11 : i64} {
  func.func @_pred_loss_kernel(%arg0: i32, %arg1: i32, %arg2: memref<16x128xf32, #tpu.memory_space<vmem>>, %arg3: memref<16x128xf32, #tpu.memory_space<vmem>>, %arg4: memref<16x128xf32, #tpu.memory_space<vmem>>, %arg5: memref<1x1x1xf32, #tpu.memory_space<vmem>>, %arg6: memref<8x128xf32, #tpu.memory_space<vmem>>) attributes {dimension_semantics = [#tpu.dimension_semantics<arbitrary>, #tpu.dimension_semantics<arbitrary>], iteration_bounds = array<i64: 1, 1>, scalar_prefetch = 0 : i64, scratch_operands = 1 : i64, tpu.core_type = #tpu.core_type<tc>, window_params = [{transform_indices = @transform_0, window_bounds = array<i64: 16, 128>}, {transform_indices = @transform_1, window_bounds = array<i64: 16, 128>}, {transform_indices = @transform_2, window_bounds = array<i64: 16, 128>}, {transform_indices = @transform_3, window_bounds = array<i64: 1, 1, 1>}]} {
    %c0_i32 = arith.constant 0 : i32
    %0 = arith.cmpi eq, %arg1, %c0_i32 : i32
    %1 = arith.extui %0 : i1 to i32
    %c0_i32_0 = arith.constant 0 : i32
    %2 = arith.cmpi ne, %1, %c0_i32_0 : i32
    scf.if %2 {
      %cst = arith.constant 0.000000e+00 : f32
      %16 = vector.broadcast %cst : f32 to vector<8x128xf32>
      %c0 = arith.constant 0 : index
      %c0_7 = arith.constant 0 : index
      %17 = vector.load %arg6[%c0, %c0_7] : memref<8x128xf32, #tpu.memory_space<vmem>>, vector<8x128xf32>
      tpu.vector_store %arg6[%c0, %c0_7], %16 {strides = array<i32>} : memref<8x128xf32, #tpu.memory_space<vmem>>, vector<8x128xf32>,
    } else {
    }
    %c1_i32 = arith.constant 1 : i32
    %3 = arith.muli %arg0, %c1_i32 : i32
    %4 = arith.addi %3, %arg1 : i32
    %c16_i32 = arith.constant 16 : i32
    %5 = arith.muli %4, %c16_i32 : i32
    %c16_i32_1 = arith.constant 16 : i32
    %6 = arith.addi %5, %c16_i32_1 : i32
    %c16_i32_2 = arith.constant 16 : i32
    %7 = arith.cmpi sgt, %6, %c16_i32_2 : i32
    %8 = arith.extui %7 : i1 to i32
    %c0_i32_3 = arith.constant 0 : i32
    %9 = arith.cmpi ne, %8, %c0_i32_3 : i32
    scf.if %9 {
      %c0 = arith.constant 0 : index
      %c0_7 = arith.constant 0 : index
      %16 = vector.load %arg2[%c0, %c0_7] : memref<16x128xf32, #tpu.memory_space<vmem>>, vector<16x128xf32>
      %c0_8 = arith.constant 0 : index
      %c0_9 = arith.constant 0 : index
      %17 = vector.load %arg3[%c0_8, %c0_9] : memref<16x128xf32, #tpu.memory_space<vmem>>, vector<16x128xf32>
      %c0_10 = arith.constant 0 : index
      %c0_11 = arith.constant 0 : index
      %18 = vector.load %arg4[%c0_10, %c0_11] : memref<16x128xf32, #tpu.memory_space<vmem>>, vector<16x128xf32>
      %19 = arith.cmpf ogt, %17, %18 : vector<16x128xf32>
      %20 = arith.extui %19 : vector<16x128xi1> to vector<16x128xi32>
      %21 = arith.sitofp %20 : vector<16x128xi32> to vector<16x128xf32>
      %22 = arith.cmpf olt, %17, %18 : vector<16x128xf32>
      %23 = arith.extui %22 : vector<16x128xi1> to vector<16x128xi32>
      %24 = arith.sitofp %23 : vector<16x128xi32> to vector<16x128xf32>
      %25 = arith.subf %21, %24 : vector<16x128xf32>
      %26 = arith.cmpf ogt, %16, %18 : vector<16x128xf32>
      %27 = arith.extui %26 : vector<16x128xi1> to vector<16x128xi32>
      %28 = arith.sitofp %27 : vector<16x128xi32> to vector<16x128xf32>
      %29 = arith.subf %25, %28 : vector<16x128xf32>
      %30 = arith.cmpf olt, %16, %18 : vector<16x128xf32>
      %31 = arith.extui %30 : vector<16x128xi1> to vector<16x128xi32>
      %32 = arith.sitofp %31 : vector<16x128xi32> to vector<16x128xf32>
      %33 = arith.addf %29, %32 : vector<16x128xf32>
      %34 = arith.mulf %33, %33 : vector<16x128xf32>
      %35 = arith.subf %16, %17 : vector<16x128xf32>
      %36 = math.absf %35 : vector<16x128xf32>
      %37 = arith.addf %34, %36 : vector<16x128xf32>
      %38 = tpu.iota {dimensions = array<i32: 0>} : vector<16x128xi32>
      %39 = vector.broadcast %5 : i32 to vector<16x128xi32>
      %40 = arith.addi %39, %38 : vector<16x128xi32>
      %c16_i32_12 = arith.constant 16 : i32
      %41 = vector.broadcast %c16_i32_12 : i32 to vector<16x128xi32>
      %42 = arith.cmpi slt, %40, %41 : vector<16x128xi32>
      %cst = arith.constant 0.000000e+00 : f32
      %43 = vector.broadcast %cst : f32 to vector<16x128xf32>
      %44 = arith.select %42, %37, %43 : vector<16x128xi1>, vector<16x128xf32>
      %c0_13 = arith.constant 0 : index
      %c0_14 = arith.constant 0 : index
      %45 = vector.load %arg6[%c0_13, %c0_14] : memref<8x128xf32, #tpu.memory_space<vmem>>, vector<8x128xf32>
      %46 = vector.shape_cast %44 : vector<16x128xf32> to vector<2x8x128xf32>
      %cst_15 = arith.constant dense<0.000000e+00> : vector<8x128xf32>
      %47 = vector.multi_reduction <add>, %46, %cst_15 [0] : vector<2x8x128xf32> to vector<8x128xf32>
      %48 = arith.addf %45, %47 : vector<8x128xf32>
      %c0_16 = arith.constant 0 : index
      %c0_17 = arith.constant 0 : index
      %49 = vector.load %arg6[%c0_16, %c0_17] : memref<8x128xf32, #tpu.memory_space<vmem>>, vector<8x128xf32>
      tpu.vector_store %arg6[%c0_16, %c0_17], %48 {strides = array<i32>} : memref<8x128xf32, #tpu.memory_space<vmem>>, vector<8x128xf32>,
    } else {
    }
    %true = arith.constant true
    %10 = arith.xori %7, %true : i1
    %11 = arith.extui %10 : i1 to i32
    %c0_i32_4 = arith.constant 0 : i32
    %12 = arith.cmpi ne, %11, %c0_i32_4 : i32
    scf.if %12 {
      %c0 = arith.constant 0 : index
      %c0_7 = arith.constant 0 : index
      %16 = vector.load %arg2[%c0, %c0_7] : memref<16x128xf32, #tpu.memory_space<vmem>>, vector<16x128xf32>
      %c0_8 = arith.constant 0 : index
      %c0_9 = arith.constant 0 : index
      %17 = vector.load %arg3[%c0_8, %c0_9] : memref<16x128xf32, #tpu.memory_space<vmem>>, vector<16x128xf32>
      %c0_10 = arith.constant 0 : index
      %c0_11 = arith.constant 0 : index
      %18 = vector.load %arg4[%c0_10, %c0_11] : memref<16x128xf32, #tpu.memory_space<vmem>>, vector<16x128xf32>
      %19 = arith.cmpf ogt, %17, %18 : vector<16x128xf32>
      %20 = arith.extui %19 : vector<16x128xi1> to vector<16x128xi32>
      %21 = arith.sitofp %20 : vector<16x128xi32> to vector<16x128xf32>
      %22 = arith.cmpf olt, %17, %18 : vector<16x128xf32>
      %23 = arith.extui %22 : vector<16x128xi1> to vector<16x128xi32>
      %24 = arith.sitofp %23 : vector<16x128xi32> to vector<16x128xf32>
      %25 = arith.subf %21, %24 : vector<16x128xf32>
      %26 = arith.cmpf ogt, %16, %18 : vector<16x128xf32>
      %27 = arith.extui %26 : vector<16x128xi1> to vector<16x128xi32>
      %28 = arith.sitofp %27 : vector<16x128xi32> to vector<16x128xf32>
      %29 = arith.subf %25, %28 : vector<16x128xf32>
      %30 = arith.cmpf olt, %16, %18 : vector<16x128xf32>
      %31 = arith.extui %30 : vector<16x128xi1> to vector<16x128xi32>
      %32 = arith.sitofp %31 : vector<16x128xi32> to vector<16x128xf32>
      %33 = arith.addf %29, %32 : vector<16x128xf32>
      %34 = arith.mulf %33, %33 : vector<16x128xf32>
      %35 = arith.subf %16, %17 : vector<16x128xf32>
      %36 = math.absf %35 : vector<16x128xf32>
      %37 = arith.addf %34, %36 : vector<16x128xf32>
      %c0_12 = arith.constant 0 : index
      %c0_13 = arith.constant 0 : index
      %38 = vector.load %arg6[%c0_12, %c0_13] : memref<8x128xf32, #tpu.memory_space<vmem>>, vector<8x128xf32>
      %39 = vector.shape_cast %37 : vector<16x128xf32> to vector<2x8x128xf32>
      %cst = arith.constant dense<0.000000e+00> : vector<8x128xf32>
      %40 = vector.multi_reduction <add>, %39, %cst [0] : vector<2x8x128xf32> to vector<8x128xf32>
      %41 = arith.addf %38, %40 : vector<8x128xf32>
      %c0_14 = arith.constant 0 : index
      %c0_15 = arith.constant 0 : index
      %42 = vector.load %arg6[%c0_14, %c0_15] : memref<8x128xf32, #tpu.memory_space<vmem>>, vector<8x128xf32>
      tpu.vector_store %arg6[%c0_14, %c0_15], %41 {strides = array<i32>} : memref<8x128xf32, #tpu.memory_space<vmem>>, vector<8x128xf32>,
    } else {
    }
    %c0_i32_5 = arith.constant 0 : i32
    %13 = arith.cmpi eq, %arg1, %c0_i32_5 : i32
    %14 = arith.extui %13 : i1 to i32
    %c0_i32_6 = arith.constant 0 : i32
    %15 = arith.cmpi ne, %14, %c0_i32_6 : i32
    scf.if %15 {
      %c0 = arith.constant 0 : index
      %c0_7 = arith.constant 0 : index
      %16 = vector.load %arg6[%c0, %c0_7] : memref<8x128xf32, #tpu.memory_space<vmem>>, vector<8x128xf32>
      %17 = vector.shape_cast %16 : vector<8x128xf32> to vector<1x8x128xf32>
      %cst = arith.constant dense<0.000000e+00> : vector<1xf32>
      %18 = vector.multi_reduction <add>, %17, %cst [1, 2] : vector<1x8x128xf32> to vector<1xf32>
      %19 = vector.shape_cast %18 : vector<1xf32> to vector<1x1x1xf32>
      %20 = vector.extract %19[0, 0, 0] : f32 from vector<1x1x1xf32>
      %21 = vector.broadcast %20 : f32 to vector<1x1x1xf32>
      %c0_8 = arith.constant 0 : index
      %c0_9 = arith.constant 0 : index
      %c0_10 = arith.constant 0 : index
      %22 = vector.load %arg5[%c0_8, %c0_9, %c0_10] : memref<1x1x1xf32, #tpu.memory_space<vmem>>, vector<1x1x1xf32>
      tpu.vector_store %arg5[%c0_8, %c0_9, %c0_10], %21 {strides = array<i32>} : memref<1x1x1xf32, #tpu.memory_space<vmem>>, vector<1x1x1xf32>,
    } else {
    }
    return
  }
  func.func @transform_0(%arg0: i32, %arg1: i32) -> (i32, i32) {
    %c1_i32 = arith.constant 1 : i32
    %0 = arith.muli %arg0, %c1_i32 : i32
    %1 = arith.addi %0, %arg1 : i32
    %c0_i32 = arith.constant 0 : i32
    %2 = arith.minsi %1, %c0_i32 : i32
    %c0_i32_0 = arith.constant 0 : i32
    %c0_i32_1 = arith.constant 0 : i32
    return %2, %c0_i32_0 : i32, i32
  }
  func.func @transform_1(%arg0: i32, %arg1: i32) -> (i32, i32) {
    %c1_i32 = arith.constant 1 : i32
    %0 = arith.muli %arg0, %c1_i32 : i32
    %1 = arith.addi %0, %arg1 : i32
    %c0_i32 = arith.constant 0 : i32
    %2 = arith.minsi %1, %c0_i32 : i32
    %c0_i32_0 = arith.constant 0 : i32
    %c0_i32_1 = arith.constant 0 : i32
    return %2, %c0_i32_0 : i32, i32
  }
  func.func @transform_2(%arg0: i32, %arg1: i32) -> (i32, i32) {
    %c1_i32 = arith.constant 1 : i32
    %0 = arith.muli %arg0, %c1_i32 : i32
    %1 = arith.addi %0, %arg1 : i32
    %c0_i32 = arith.constant 0 : i32
    %2 = arith.minsi %1, %c0_i32 : i32
    %c0_i32_0 = arith.constant 0 : i32
    %c0_i32_1 = arith.constant 0 : i32
    return %2, %c0_i32_0 : i32, i32
  }
  func.func @transform_3(%arg0: i32, %arg1: i32) -> (i32, i32, i32) {
    %c0_i32 = arith.constant 0 : i32
    %c0_i32_0 = arith.constant 0 : i32
    %c0_i32_1 = arith.constant 0 : i32
    return %arg0, %c0_i32, %c0_i32_0 : i32, i32, i32
  }
}

</mosaic_0001>

<bundles_post_ra>
// kernel: tpu_custom_call.1
= control target key start
LH: loop header
LB: loop body
LE: loop exit
PB: predicated region body
PF: predicated region fallthrough
CT: control target
= control target key end

     0   :  { %8 = vsyncpa [#allocation4], 0  ;;  %s456_s0 = inlined_call_operand.hbm [shape: f32[16,128], index: 0, kind: input, shape index: {}]   ;;  %s457_s1 = inlined_call_operand.hbm [shape: f32[16,128], index: 1, kind: input, shape index: {}]   ;;  %s458_s2 = inlined_call_operand.hbm [shape: f32[16,128], index: 2, kind: input, shape index: {}]   ;;  %s459_s3 = inlined_call_operand.hbm [shape: f32[1,1,1], index: 3, kind: output, shape index: {}]  }
   0x1   :  { %9 = vsyncpa [#allocation7], 0 }
   0x2   :  { %10 = vsyncpa [#allocation5], 0  ;;  %s365_s12 = smov [#allocation6]   ;;  %s366_s14 = smov [#allocation3]  }
   0x3   :  { %s40_s13 = sshll.u32 %s365_s12, 4  ;;  %s22_s15 = sshll.u32 %s366_s14, 4  ;;  %s41_s13 = int_to_ptr.vmem [resolvable:$true] %s40_s13  ;;  %s392_s15 = int_to_ptr.vmem [resolvable:$true] %s22_s15 }
   0x4   :  { %s271_s18 = scalar_lea.hbm %s457_s1, 256 }
   0x5   :  { %p272_p0 = scmp.ne.s32.totalorder %s457_s1, %s271_s18  ;;  %p275_p1 = scmp.lt.u32.totalorder %s271_s18, %s457_s1 }
   0x7   :  { %p277_p2 = pnand %p275_p1, %p272_p0 }
   0x9   :  { %280 = shalt.err (!%p277_p2)
}
   0xa   :  { %s281_s23 = scalar_lea.vmem %s41_s13, 256  ;;  %p286_p4 = scmp.lt.s32.totalorder %s41_s13, %s41_s13 }
   0xb   :  { %p282_p3 = scmp.ne.s32.totalorder %s41_s13, %s281_s23  ;;  %p287_p5 = scmp.lt.s32.totalorder %s281_s23, %s281_s23 }
   0xd   :  { %p288_p6 = por %p287_p5, %p286_p4 }
   0xf   :  { %p289_p7 = pnand %p288_p6, %p282_p3 }
  0x11   :  { %292 = shalt.err (!%p289_p7)
}
  0x12   :  { %s367_s24 = smov 128   ;;  %s368_s25 = smov 8  }
  0x13   :  { %46 = dma.hbm_to_vmem [thread:$0]  %s457_s1, 256, %s41_s13, [#allocation7], %s367_s24, %s367_s24, %s368_s25  }
  0x14   :  { %s293_s30 = scalar_lea.hbm %s456_s0, 256 }
  0x15   :  { %p294_p8 = scmp.ne.s32.totalorder %s456_s0, %s293_s30  ;;  %p297_p9 = scmp.lt.u32.totalorder %s293_s30, %s456_s0 }
  0x17   :  { %p299_p10 = pnand %p297_p9, %p294_p8 }
  0x19   :  { %302 = shalt.err (!%p299_p10)
}
  0x1a   :  { %s303_s8 = scalar_lea.vmem %s392_s15, 256  ;;  %p308_p12 = scmp.lt.s32.totalorder %s392_s15, %s392_s15 }
  0x1b   :  { %p304_p11 = scmp.ne.s32.totalorder %s392_s15, %s303_s8  ;;  %p309_p13 = scmp.lt.s32.totalorder %s303_s8, %s303_s8 }
  0x1d   :  { %p310_p0 = por %p309_p13, %p308_p12 }
  0x1f   :  { %p311_p1 = pnand %p310_p0, %p304_p11 }
  0x21   :  { %314 = shalt.err (!%p311_p1)
}
  0x22   :  { %28 = dma.hbm_to_vmem [thread:$0]  %s456_s0, 256, %s392_s15, [#allocation4], %s367_s24, %s367_s24, %s368_s25  }
  0x23   :  { %s369_s10 = smov [#allocation8]   ;;  %s315_s14 = scalar_lea.hbm %s458_s2, 256 }
  0x24   :  { %s58_s11 = sshll.u32 %s369_s10, 4  ;;  %p316_p2 = scmp.ne.s32.totalorder %s458_s2, %s315_s14  ;;  %s59_s11 = int_to_ptr.vmem [resolvable:$true] %s58_s11 }
  0x25   :  { %p319_p3 = scmp.lt.u32.totalorder %s315_s14, %s458_s2 }
  0x27   :  { %p321_p4 = pnand %p319_p3, %p316_p2 }
  0x29   :  { %324 = shalt.err (!%p321_p4)
}
  0x2a   :  { %s325_s20 = scalar_lea.vmem %s59_s11, 256  ;;  %p330_p6 = scmp.lt.s32.totalorder %s59_s11, %s59_s11 }
  0x2b   :  { %p326_p5 = scmp.ne.s32.totalorder %s59_s11, %s325_s20  ;;  %p331_p7 = scmp.lt.s32.totalorder %s325_s20, %s325_s20 }
  0x2d   :  { %p332_p8 = por %p331_p7, %p330_p6 }
  0x2f   :  { %p333_p9 = pnand %p332_p8, %p326_p5 }
  0x31   :  { %336 = shalt.err (!%p333_p9)
}
  0x32   :  { %64 = dma.hbm_to_vmem [thread:$0]  %s458_s2, 256, %s59_s11, [#allocation7], %s367_s24, %s367_s24, %s368_s25  }
  0x33   :  { %359 = dma.done.wait [#allocation4], 256  }
  0x34   :  { %360 = vsyncadd [#allocation4], 4294967040 }
  0x35   :  { %361 = dma.done.wait [#allocation7], 512  }
  0x36   :  { %362 = vsyncadd [#allocation7], 4294966784  ;;  %v160_v0 = vld [vmem:[#allocation3] sm:$0xff]  ;;  %v161_v1 = vld [vmem:[#allocation3 + $0x8] sm:$0xff]  ;;  %v370_v7 = vmov 0.0   ;;  %s371_s2 = smov [#allocation9]  }
  0x37   :  { %v162_v2 = vld [vmem:[#allocation6] sm:$0xff]  ;;  %v163_v3 = vld [vmem:[#allocation6 + $0x8] sm:$0xff]  ;;  %v164_v4 = vld [vmem:[#allocation8] sm:$0xff]  ;;  %s230_s21 = sshll.u32 %s371_s2, 4  ;;  %vm222_vm8 = vcmask 0   ;;  %s231_s21 = int_to_ptr.vmem [resolvable:$true] %s230_s21 }
  0x38   :  { %v165_v5 = vld [vmem:[#allocation8 + $0x8] sm:$0xff]  ;;  %v198_v6 = vsub.f32 %v160_v0, %v162_v2  ;;  %vm166_vm0 = vcmp.gt.f32.partialorder %v162_v2, %v164_v4  ;;  %vm172_vm2 = vcmp.lt.f32.partialorder %v162_v2, %v164_v4  ;;  %vm180_vm4 = vcmp.gt.f32.partialorder %v160_v0, %v164_v4  ;;  %s337_s23 = scalar_lea.vmem %s231_s21, 16  ;;  %s341_s24 = scalar_lea.vmem %s231_s21, 32 }
  0x39   :  { %vm167_vm1 = vcmp.gt.f32.partialorder %v163_v3, %v165_v5  ;;  %vm173_vm3 = vcmp.lt.f32.partialorder %v163_v3, %v165_v5  ;;  %v254_v8 = vsel %vm166_vm0, 1.0, %v370_v7  ;;  %v256_v10 = vsel %vm172_vm2, 1.0, %v370_v7  ;;  %p338_p10 = scmp.ne.s32.totalorder %s231_s21, %s337_s23  ;;  %p342_p11 = scmp.lt.s32.totalorder %s231_s21, %s231_s21 }
  0x3a   :  { %v255_v9 = vsel %vm167_vm1, 1.0, %v370_v7  ;;  %v257_v11 = vsel %vm173_vm3, 1.0, %v370_v7  ;;  %v178_v12 = vsub.f32 %v254_v8, %v256_v10  ;;  %vm181_vm5 = vcmp.gt.f32.partialorder %v161_v1, %v165_v5  ;;  %p343_p12 = scmp.lt.s32.totalorder %s341_s24, %s337_s23 }
  0x3b   :  { %v179_v13 = vsub.f32 %v255_v9, %v257_v11  ;;  %v258_v14 = vsel %vm180_vm4, 1.0, %v370_v7  ;;  %v259_v15 = vsel %vm181_vm5, 1.0, %v370_v7  ;;  %vm188_vm6 = vcmp.lt.f32.partialorder %v160_v0, %v164_v4 }
  0x3c   :  { %vm189_vm7 = vcmp.lt.f32.partialorder %v161_v1, %v165_v5  ;;  %v186_v16 = vsub.f32 %v178_v12, %v258_v14  ;;  %v260_v18 = vsel %vm188_vm6, 1.0, %v370_v7  ;;  %v199_v20 = vsub.f32 %v161_v1, %v163_v3  ;;  %p344_p13 = por %p343_p12, %p342_p11 }
  0x3d   :  { %v187_v17 = vsub.f32 %v179_v13, %v259_v15  ;;  %v261_v19 = vsel %vm189_vm7, 1.0, %v370_v7  ;;  %v200_v23 = vand.u32 2147483647, %v198_v6 }
  0x3e   :  { %v194_v21 = vadd.f32 %v260_v18, %v186_v16  ;;  %v201_v24 = vand.u32 2147483647, %v199_v20  ;;  %p345_p0 = pnand %p344_p13, %p338_p10 }
  0x3f   :  { %v195_v22 = vadd.f32 %v261_v19, %v187_v17 }
  0x40   :  { %v196_v25 = vmul.f32 %v194_v21, %v194_v21 }
  0x41   :  { %v197_v26 = vmul.f32 %v195_v22, %v195_v22 }
  0x42   :  { %v202_v27 = vadd.f32 %v200_v23, %v196_v25 }
  0x43   :  { %v203_v28 = vadd.f32 %v201_v24, %v197_v26 }
  0x45   :  { %v205_v29 = vadd.f32 %v203_v28, %v202_v27 }
  0x47   :  { %212 = vadd.xlane.f32.xlu0 %v205_v29 }
  0xd4   :  { %v213_v30 = vpop.xlane.xlu0 %212 }
  0xd5   :  { %v214_v31 = vrot.slane %v213_v30, 4 }
  0xd7   :  { %v215_v32 = vadd.f32 %v214_v31, %v213_v30 }
  0xd9   :  { %v216_v33 = vrot.slane %v215_v32, 2 }
  0xdb   :  { %v217_v34 = vadd.f32 %v216_v33, %v215_v32 }
  0xdd   :  { %v218_v35 = vrot.slane %v217_v34, 1 }
  0xdf   :  { %v219_v36 = vadd.f32 %v218_v35, %v217_v34 }
  0xe1   :  { %262 = vpush %v219_v36 }
 0x112   :  { %s263_s22 = spop %262 }
 0x113   :  { %v221_v37 = vstv %s263_s22 }
 0x114   :  { %223 = vst.msk [vmem:[#allocation9] sm:$0x1] %vm222_vm8, %v221_v37 }
 0x115   :  { %348 = shalt.err (!%p345_p0)
}
 0x116   :  { %s349_s27 = scalar_lea.hbm %s459_s3, 16 }
 0x117   :  { %p350_p1 = scmp.ne.s32.totalorder %s459_s3, %s349_s27  ;;  %p353_p2 = scmp.lt.u32.totalorder %s349_s27, %s459_s3 }
 0x119   :  { %p355_p3 = pnand %p353_p2, %p350_p1 }
 0x11b   :  { %358 = shalt.err (!%p355_p3)
}
 0x11c   :  { %233 = dma.vmem_to_hbm [thread:$0]  %s231_s21, 16, %s459_s3, [#allocation5]  }
 0x11d   :  { %363 = dma.done.wait [#allocation5], 16  }
 0x11e   :  { %364 = vsyncadd [#allocation5], 4294967280 }
 0x11f   :  { %237 = vsyncpa [#allocation4], 1 }
 0x120   :  { %238 = vsyncpa [#allocation7], 1 }
 0x121   :  { %239 = vsyncpa [#allocation5], 1 }

</bundles_post_ra>
